<compile_context>
chip_gen: v5e
topology: v5e:2x2
jax: 0.10.0
libtpu: 0.0.40
codegen_flags: <defaults>
</compile_context>

<pallas_src>
import jax
import jax.numpy as jnp
from jax.experimental import pallas as pl
from jax.experimental.pallas import tpu as pltpu

IN_FEATURES = 100
OUT_FEATURES = 100


def _round_up(a, b):
    return ((a + b - 1) // b) * b


def linear_hardsigmoid_kernel(x_ref, w_ref, b_ref, o_ref):
    # x_ref: (tm, K), w_ref: (K, N), b_ref: (1, N), o_ref: (tm, N)
    # Weights/bias already carry the 1/6 scale and the +3 shift, so the
    # epilogue is just a clip to [0, 1] on the VPU before one store.
    acc = jnp.dot(x_ref[...], w_ref[...], preferred_element_type=jnp.float32)
    v = acc + b_ref[...]
    o_ref[...] = jnp.clip(v, 0.0, 1.0).astype(o_ref.dtype)


def _choose_tiling(M, max_tm):
    """Pick (tm, grid_steps) for the row dimension."""
    if M <= max_tm:
        # One big tile: block equals the full row extent (legal for any M).
        return M, 1
    steps = pl.cdiv(M, max_tm)
    if steps % 2:
        # Balance across v7x's two TensorCores (parallel grid axis). The
        # extra step is ~0.35us on single-TC chips — negligible.
        steps += 1
    tm = _round_up(pl.cdiv(M, steps), 8)
    steps = pl.cdiv(M, tm)
    return tm, steps


def model_forward(x, w, b, *, max_tm=4096):
    """x: (M, K) f32, w: (N, K) PyTorch Linear layout, b: (N,)."""
    M, K = x.shape
    N, Kw = w.shape
    assert K == Kw and b.shape == (N,)

    # Fold the whole epilogue affine into the tiny weight/bias tensors:
    #   hardsigmoid-ish:  clamp(x@W^T + b + 3, 0, 6) / 6
    #                  == clamp(x @ (W^T/6) + (b+3)/6, 0, 1)
    w_t = (w.T * (1.0 / 6.0)).astype(x.dtype)               # (K, N)
    b_row = ((b + 3.0) * (1.0 / 6.0)).reshape(1, N).astype(x.dtype)

    tm, steps = _choose_tiling(M, max_tm)

    out = pl.pallas_call(
        linear_hardsigmoid_kernel,
        out_shape=jax.ShapeDtypeStruct((M, N), x.dtype),
        grid_spec=pltpu.PrefetchScalarGridSpec(
            num_scalar_prefetch=0,
            grid=(steps,),
            in_specs=[
                pl.BlockSpec((tm, K), lambda i: (i, 0)),   # x: rows tiled, K full
                pl.BlockSpec((K, N), lambda i: (0, 0)),    # weight resident
                pl.BlockSpec((1, N), lambda i: (0, 0)),    # bias resident
            ],
            out_specs=pl.BlockSpec((tm, N), lambda i: (i, 0)),
        ),
        compiler_params=pltpu.CompilerParams(
            dimension_semantics=("parallel",)),
    )(x, w_t, b_row)

    return out


def _reference(x, w, b):
    return jnp.clip(x @ w.T + b + 3.0, 0.0, 6.0) / 6.0


if __name__ == "__main__":
    key = jax.random.PRNGKey(0)
    kx, kw, kb = jax.random.split(key, 3)

    # Deterministic PyTorch-style Linear init: U(-1/sqrt(in), 1/sqrt(in)).
    bound = 1.0 / (IN_FEATURES ** 0.5)
    w = jax.random.uniform(kw, (OUT_FEATURES, IN_FEATURES),
                           minval=-bound, maxval=bound, dtype=jnp.float32)
    b = jax.random.uniform(kb, (OUT_FEATURES,),
                           minval=-bound, maxval=bound, dtype=jnp.float32)

    # Small demo batch (original spec uses 10000 rows; any M works).
    M = 256
    x = jax.random.normal(kx, (M, IN_FEATURES), dtype=jnp.float32)
    out = jax.block_until_ready(model_forward(x, w, b))
    ref = _reference(x, w, b)
    assert out.shape == (M, OUT_FEATURES)
    assert jnp.allclose(out, ref, atol=1e-5, rtol=1e-5)

    # Ragged batch (not a multiple of 8), single full-extent block.
    M2 = 250
    x2 = jax.random.normal(kx, (M2, IN_FEATURES), dtype=jnp.float32)
    out2 = jax.block_until_ready(model_forward(x2, w, b))
    ref2 = _reference(x2, w, b)
    assert out2.shape == (M2, OUT_FEATURES)
    assert jnp.allclose(out2, ref2, atol=1e-5, rtol=1e-5)

    # Multi-step grid with a partial last block (exercises Pallas's
    # boundary-block masking: only valid rows are written back).
    out3 = jax.block_until_ready(model_forward(x2, w, b, max_tm=64))
    assert out3.shape == (M2, OUT_FEATURES)
    assert jnp.allclose(out3, ref2, atol=1e-5, rtol=1e-5)

    print("KERNEL_OK")
</pallas_src>

<mosaic_0001>
module attributes {stable_mosaic.version = 11 : i64} {
  func.func @linear_hardsigmoid_kernel(%arg0: i32, %arg1: memref<256x100xf32, #tpu.memory_space<vmem>>, %arg2: memref<100x100xf32, #tpu.memory_space<vmem>>, %arg3: memref<1x100xf32, #tpu.memory_space<vmem>>, %arg4: memref<256x100xf32, #tpu.memory_space<vmem>>) attributes {dimension_semantics = [#tpu.dimension_semantics<parallel>], iteration_bounds = array<i64: 1>, scalar_prefetch = 0 : i64, scratch_operands = 0 : i64, tpu.core_type = #tpu.core_type<tc>, window_params = [{transform_indices = @transform_0, window_bounds = array<i64: 256, 100>}, {pipeline_mode = #tpu.pipeline_mode<synchronous>, transform_indices = @transform_1, window_bounds = array<i64: 100, 100>}, {pipeline_mode = #tpu.pipeline_mode<synchronous>, transform_indices = @transform_2, window_bounds = array<i64: 1, 100>}, {transform_indices = @transform_3, window_bounds = array<i64: 256, 100>}]} {
    %c0 = arith.constant 0 : index
    %c0_0 = arith.constant 0 : index
    %0 = vector.load %arg1[%c0, %c0_0] : memref<256x100xf32, #tpu.memory_space<vmem>>, vector<256x100xf32>
    %c0_1 = arith.constant 0 : index
    %c0_2 = arith.constant 0 : index
    %1 = vector.load %arg2[%c0_1, %c0_2] : memref<100x100xf32, #tpu.memory_space<vmem>>, vector<100x100xf32>
    %cst = arith.constant dense<0.000000e+00> : vector<256x100xf32>
    %2 = tpu.matmul %0, %1, %cst {dimension_numbers = #tpu.dot_dimension_numbers<[1], [0], [0], [1], [0, 0, 1, 1], [], []>} : vector<256x100xf32>, vector<100x100xf32>, vector<256x100xf32> -> vector<256x100xf32>
    %c0_3 = arith.constant 0 : index
    %c0_4 = arith.constant 0 : index
    %3 = vector.load %arg3[%c0_3, %c0_4] : memref<1x100xf32, #tpu.memory_space<vmem>>, vector<1x100xf32>
    %4 = vector.broadcast %3 : vector<1x100xf32> to vector<256x100xf32>
    %5 = arith.addf %2, %4 : vector<256x100xf32>
    %cst_5 = arith.constant 0.000000e+00 : f32
    %cst_6 = arith.constant 1.000000e+00 : f32
    %6 = vector.broadcast %cst_5 : f32 to vector<256x100xf32>
    %7 = arith.maximumf %6, %5 : vector<256x100xf32>
    %8 = vector.broadcast %cst_6 : f32 to vector<256x100xf32>
    %9 = arith.minimumf %8, %7 : vector<256x100xf32>
    %c0_7 = arith.constant 0 : index
    %c0_8 = arith.constant 0 : index
    %10 = vector.load %arg4[%c0_7, %c0_8] : memref<256x100xf32, #tpu.memory_space<vmem>>, vector<256x100xf32>
    tpu.vector_store %arg4[%c0_7, %c0_8], %9 {strides = array<i32>} : memref<256x100xf32, #tpu.memory_space<vmem>>, vector<256x100xf32>,
    return
  }
  func.func @transform_0(%arg0: i32) -> (i32, i32) {
    %c0_i32 = arith.constant 0 : i32
    %c0_i32_0 = arith.constant 0 : i32
    return %arg0, %c0_i32 : i32, i32
  }
  func.func @transform_1(%arg0: i32) -> (i32, i32) {
    %c0_i32 = arith.constant 0 : i32
    %c0_i32_0 = arith.constant 0 : i32
    %c0_i32_1 = arith.constant 0 : i32
    return %c0_i32, %c0_i32_0 : i32, i32
  }
  func.func @transform_2(%arg0: i32) -> (i32, i32) {
    %c0_i32 = arith.constant 0 : i32
    %c0_i32_0 = arith.constant 0 : i32
    %c0_i32_1 = arith.constant 0 : i32
    return %c0_i32, %c0_i32_0 : i32, i32
  }
  func.func @transform_3(%arg0: i32) -> (i32, i32) {
    %c0_i32 = arith.constant 0 : i32
    %c0_i32_0 = arith.constant 0 : i32
    return %arg0, %c0_i32 : i32, i32
  }
}

</mosaic_0001>

<bundles_post_ra>
// kernel: tpu_custom_call.1
= control target key start
LH: loop header
LB: loop body
LE: loop exit
PB: predicated region body
PF: predicated region fallthrough
CT: control target
= control target key end

     0   :  { %vm160_vm0 = vcmask 1043456   ;;  %vm63_vm1 = vcmask 818176   ;;  %s802_s1 = inlined_call_operand.vmem [shape: f32[100,100], index: 1, kind: input, shape index: {}]   ;;  %s803_s2 = inlined_call_operand.vmem [shape: f32[1,100], index: 2, kind: input, shape index: {}]   ;;  %s804_s0 = inlined_call_operand.vmem [shape: f32[256,100], index: 0, kind: input, shape index: {}]   ;;  %s805_s3 = inlined_call_operand.vmem [shape: f32[256,100], index: 3, kind: output, shape index: {}]  }
   0x1   :  { %v58_v0 = vld [vmem:[%s802_s1 + $0x60] sm:$0xf]  ;;  %v57_v1 = vld [vmem:[%s802_s1 + $0x58] sm:$0xff]  ;;  %v56_v2 = vld [vmem:[%s802_s1 + $0x50] sm:$0xff] }
   0x2   :  { %411 = vmatpush.msk.msra.mxu2 %vm160_vm0, %v58_v0  ;;  %412 = vmatpush.msk.msra.mxu3 %vm160_vm0, %v58_v0  ;;  %v55_v3 = vld [vmem:[%s802_s1 + $0x48] sm:$0xff]  ;;  %v54_v4 = vld [vmem:[%s802_s1 + $0x40] sm:$0xff]  ;;  %v53_v5 = vld [vmem:[%s802_s1 + $0x38] sm:$0xff] }
   0x3   :  { %377 = vmatpush.msk.msra.mxu0 %vm160_vm0, %v58_v0  ;;  %410 = vmatpush.msk.msra.mxu1 %vm160_vm0, %v58_v0  ;;  %v52_v6 = vld [vmem:[%s802_s1 + $0x30] sm:$0xff]  ;;  %v51_v7 = vld [vmem:[%s802_s1 + $0x28] sm:$0xff]  ;;  %v50_v8 = vld [vmem:[%s802_s1 + $0x20] sm:$0xff] }
   0x4   :  { %414 = vmatpush.msra.mxu2 %v57_v1  ;;  %415 = vmatpush.msra.mxu3 %v57_v1  ;;  %v49_v9 = vld [vmem:[%s802_s1 + $0x18] sm:$0xff]  ;;  %v48_v10 = vld [vmem:[%s802_s1 + $0x10] sm:$0xff]  ;;  %v47_v11 = vld [vmem:[%s802_s1 + $0x8] sm:$0xff] }
   0x5   :  { %168 = vmatpush.msra.mxu0 %v57_v1  ;;  %413 = vmatpush.msra.mxu1 %v57_v1  ;;  %v46_v12 = vld [vmem:[%s802_s1] sm:$0xff]  ;;  %v31_v17 = vld [vmem:[%s804_s0 + $0x88] sm:$0xff]  ;;  %v32_v21 = vld [vmem:[%s804_s0 + $0x90] sm:$0xff] }
   0x6   :  { %417 = vmatpush.msra.mxu2 %v56_v2  ;;  %418 = vmatpush.msra.mxu3 %v56_v2  ;;  %v30_v13 = vld [vmem:[%s804_s0 + $0x80] sm:$0xff]  ;;  %v39_v18 = vld [vmem:[%s804_s0 + $0xc8] sm:$0xff]  ;;  %v40_v22 = vld [vmem:[%s804_s0 + $0xd0] sm:$0xff] }
   0x7   :  { %169 = vmatpush.msra.mxu0 %v56_v2  ;;  %416 = vmatpush.msra.mxu1 %v56_v2  ;;  %v38_v14 = vld [vmem:[%s804_s0 + $0xc0] sm:$0xff]  ;;  %v15_v19 = vld [vmem:[%s804_s0 + $0x8] sm:$0xff]  ;;  %v16_v23 = vld [vmem:[%s804_s0 + $0x10] sm:$0xff] }
   0x8   :  { %420 = vmatpush.msra.mxu2 %v55_v3  ;;  %421 = vmatpush.msra.mxu3 %v55_v3  ;;  %v14_v15 = vld [vmem:[%s804_s0] sm:$0xff]  ;;  %v23_v20 = vld [vmem:[%s804_s0 + $0x48] sm:$0xff]  ;;  %v24_v24 = vld [vmem:[%s804_s0 + $0x50] sm:$0xff] }
   0x9   :  { %170 = vmatpush.msra.mxu0 %v55_v3  ;;  %419 = vmatpush.msra.mxu1 %v55_v3  ;;  %v22_v16 = vld [vmem:[%s804_s0 + $0x40] sm:$0xff]  ;;  %v33_v25 = vld [vmem:[%s804_s0 + $0x98] sm:$0xff]  ;;  %v35_v33 = vld [vmem:[%s804_s0 + $0xa8] sm:$0xff] }
   0xa   :  { %423 = vmatpush.msra.mxu2 %v54_v4  ;;  %424 = vmatpush.msra.mxu3 %v54_v4  ;;  %v41_v26 = vld [vmem:[%s804_s0 + $0xd8] sm:$0xff]  ;;  %v34_v29 = vld [vmem:[%s804_s0 + $0xa0] sm:$0xff]  ;;  %v43_v34 = vld [vmem:[%s804_s0 + $0xe8] sm:$0xff] }
   0xb   :  { %171 = vmatpush.msra.mxu0 %v54_v4  ;;  %422 = vmatpush.msra.mxu1 %v54_v4  ;;  %v17_v27 = vld [vmem:[%s804_s0 + $0x18] sm:$0xff]  ;;  %v42_v30 = vld [vmem:[%s804_s0 + $0xe0] sm:$0xff]  ;;  %v19_v35 = vld [vmem:[%s804_s0 + $0x28] sm:$0xff] }
   0xc   :  { %426 = vmatpush.msra.mxu2 %v53_v5  ;;  %427 = vmatpush.msra.mxu3 %v53_v5  ;;  %v25_v28 = vld [vmem:[%s804_s0 + $0x58] sm:$0xff]  ;;  %v18_v31 = vld [vmem:[%s804_s0 + $0x20] sm:$0xff]  ;;  %v27_v36 = vld [vmem:[%s804_s0 + $0x68] sm:$0xff] }
   0xd   :  { %172 = vmatpush.msra.mxu0 %v53_v5  ;;  %425 = vmatpush.msra.mxu1 %v53_v5  ;;  %v26_v32 = vld [vmem:[%s804_s0 + $0x60] sm:$0xff]  ;;  %v36_v37 = vld [vmem:[%s804_s0 + $0xb0] sm:$0xff]  ;;  %v37_v41 = vld [vmem:[%s804_s0 + $0xb8] sm:$0xff] }
   0xe   :  { %429 = vmatpush.msra.mxu2 %v52_v6  ;;  %430 = vmatpush.msra.mxu3 %v52_v6  ;;  %v44_v38 = vld [vmem:[%s804_s0 + $0xf0] sm:$0xff]  ;;  %v45_v42 = vld [vmem:[%s804_s0 + $0xf8] sm:$0xff]  ;;  %v640_v45 = vld [vmem:[%s803_s2] ss:$0 sm:$0xff] }
   0xf   :  { %173 = vmatpush.msra.mxu0 %v52_v6  ;;  %428 = vmatpush.msra.mxu1 %v52_v6  ;;  %v20_v39 = vld [vmem:[%s804_s0 + $0x30] sm:$0xff]  ;;  %v21_v43 = vld [vmem:[%s804_s0 + $0x38] sm:$0xff] }
  0x10   :  { %432 = vmatpush.msra.mxu2 %v51_v7  ;;  %433 = vmatpush.msra.mxu3 %v51_v7  ;;  %v28_v40 = vld [vmem:[%s804_s0 + $0x70] sm:$0xff]  ;;  %v29_v44 = vld [vmem:[%s804_s0 + $0x78] sm:$0xff] }
  0x11   :  { %174 = vmatpush.msra.mxu0 %v51_v7  ;;  %431 = vmatpush.msra.mxu1 %v51_v7 }
  0x12   :  { %435 = vmatpush.msra.mxu2 %v50_v8  ;;  %436 = vmatpush.msra.mxu3 %v50_v8 }
  0x13   :  { %175 = vmatpush.msra.mxu0 %v50_v8  ;;  %434 = vmatpush.msra.mxu1 %v50_v8 }
  0x14   :  { %438 = vmatpush.msra.mxu2 %v49_v9  ;;  %439 = vmatpush.msra.mxu3 %v49_v9 }
  0x15   :  { %176 = vmatpush.msra.mxu0 %v49_v9  ;;  %437 = vmatpush.msra.mxu1 %v49_v9 }
  0x16   :  { %441 = vmatpush.msra.mxu2 %v48_v10  ;;  %442 = vmatpush.msra.mxu3 %v48_v10 }
  0x17   :  { %177 = vmatpush.msra.mxu0 %v48_v10  ;;  %440 = vmatpush.msra.mxu1 %v48_v10 }
  0x18   :  { %444 = vmatpush.msra.mxu2 %v47_v11  ;;  %445 = vmatpush.msra.mxu3 %v47_v11 }
  0x19   :  { %178 = vmatpush.msra.mxu0 %v47_v11  ;;  %443 = vmatpush.msra.mxu1 %v47_v11 }
  0x1a   :  { %447 = vmatpush.msra.mxu2 %v46_v12  ;;  %448 = vmatpush.msra.mxu3 %v46_v12 }
  0x1b   :  { %394 = vmatmul.msk.f32.vlgmr.msra.gmra.mxu2 %vm63_vm1, %v30_v13  ;;  %402 = vmatmul.msk.f32.vlgmr.msra.gmra.mxu3 %vm63_vm1, %v38_v14 }
  0x1c   :  { %179 = vmatpush.msra.mxu0 %v46_v12  ;;  %446 = vmatpush.msra.mxu1 %v46_v12 }
  0x1d   :  { %378 = vmatmul.msk.f32.vlgmr.msra.gmra.mxu0 %vm63_vm1, %v14_v15  ;;  %386 = vmatmul.msk.f32.vlgmr.msra.gmra.mxu1 %vm63_vm1, %v22_v16 }
  0x23   :  { %395 = vmatmul.msk.f32.gmra.mxu2 %vm63_vm1, %v31_v17  ;;  %403 = vmatmul.msk.f32.gmra.mxu3 %vm63_vm1, %v39_v18 }
  0x25   :  { %379 = vmatmul.msk.f32.gmra.mxu0 %vm63_vm1, %v15_v19  ;;  %387 = vmatmul.msk.f32.gmra.mxu1 %vm63_vm1, %v23_v20 }
  0x2b   :  { %396 = vmatmul.msk.f32.gmra.mxu2 %vm63_vm1, %v32_v21  ;;  %404 = vmatmul.msk.f32.gmra.mxu3 %vm63_vm1, %v40_v22 }
  0x2d   :  { %380 = vmatmul.msk.f32.gmra.mxu0 %vm63_vm1, %v16_v23  ;;  %388 = vmatmul.msk.f32.gmra.mxu1 %vm63_vm1, %v24_v24 }
  0x33   :  { %397 = vmatmul.msk.f32.gmra.mxu2 %vm63_vm1, %v33_v25  ;;  %405 = vmatmul.msk.f32.gmra.mxu3 %vm63_vm1, %v41_v26 }
  0x35   :  { %381 = vmatmul.msk.f32.gmra.mxu0 %vm63_vm1, %v17_v27  ;;  %389 = vmatmul.msk.f32.gmra.mxu1 %vm63_vm1, %v25_v28 }
  0x3b   :  { %398 = vmatmul.msk.f32.gmra.mxu2 %vm63_vm1, %v34_v29  ;;  %406 = vmatmul.msk.f32.gmra.mxu3 %vm63_vm1, %v42_v30 }
  0x3d   :  { %382 = vmatmul.msk.f32.gmra.mxu0 %vm63_vm1, %v18_v31  ;;  %390 = vmatmul.msk.f32.gmra.mxu1 %vm63_vm1, %v26_v32 }
  0x43   :  { %399 = vmatmul.msk.f32.gmra.mxu2 %vm63_vm1, %v35_v33  ;;  %407 = vmatmul.msk.f32.gmra.mxu3 %vm63_vm1, %v43_v34 }
  0x45   :  { %383 = vmatmul.msk.f32.gmra.mxu0 %vm63_vm1, %v19_v35  ;;  %391 = vmatmul.msk.f32.gmra.mxu1 %vm63_vm1, %v27_v36 }
  0x4b   :  { %400 = vmatmul.msk.f32.gmra.mxu2 %vm63_vm1, %v36_v37  ;;  %408 = vmatmul.msk.f32.gmra.mxu3 %vm63_vm1, %v44_v38 }
  0x4d   :  { %384 = vmatmul.msk.f32.gmra.mxu0 %vm63_vm1, %v20_v39  ;;  %392 = vmatmul.msk.f32.gmra.mxu1 %vm63_vm1, %v28_v40 }
  0x53   :  { %401 = vmatmul.msk.f32.gmra.mxu2 %vm63_vm1, %v37_v41  ;;  %409 = vmatmul.msk.f32.gmra.mxu3 %vm63_vm1, %v45_v42 }
  0x55   :  { %385 = vmatmul.msk.f32.gmra.mxu0 %vm63_vm1, %v21_v43  ;;  %393 = vmatmul.msk.f32.gmra.mxu1 %vm63_vm1, %v29_v44 }
  0x9a   :  { %v181_v46 = vpop.f32.mrf.mxu0  ;;  %v205_v47 = vpop.f32.mrf.mxu1 }
  0x9b   :  { %v182_v48 = vadd.f32 %v640_v45, %v181_v46  ;;  %v206_v49 = vadd.f32 %v640_v45, %v205_v47 }
  0x9d   :  { %v277_v50 = vmax.f32 %v182_v48, 0.0  ;;  %v285_v51 = vmax.f32 %v206_v49, 0.0 }
  0x9e   :  { %v229_v52 = vpop.f32.mrf.mxu2  ;;  %v253_v53 = vpop.f32.mrf.mxu3 }
  0x9f   :  { %v309_v54 = vmin.f32 %v277_v50, 1.0  ;;  %v317_v55 = vmin.f32 %v285_v51, 1.0  ;;  %v230_v56 = vadd.f32 %v640_v45, %v229_v52  ;;  %v254_v57 = vadd.f32 %v640_v45, %v253_v53 }
  0xa1   :  { %341 = vst.msk [vmem:[%s805_s3] sm:$0xff] %vm63_vm1, %v309_v54  ;;  %v293_v58 = vmax.f32 %v230_v56, 0.0  ;;  %v301_v59 = vmax.f32 %v254_v57, 0.0 }
  0xa2   :  { %349 = vst.msk [vmem:[%s805_s3 + $0x40] sm:$0xff] %vm63_vm1, %v317_v55  ;;  %v184_v60 = vpop.f32.mrf.mxu0  ;;  %v208_v61 = vpop.f32.mrf.mxu1 }
  0xa3   :  { %v325_v62 = vmin.f32 %v293_v58, 1.0  ;;  %v333_v63 = vmin.f32 %v301_v59, 1.0  ;;  %v185_v0 = vadd.f32 %v640_v45, %v184_v60  ;;  %v209_v1 = vadd.f32 %v640_v45, %v208_v61 }
  0xa5   :  { %357 = vst.msk [vmem:[%s805_s3 + $0x80] sm:$0xff] %vm63_vm1, %v325_v62  ;;  %v278_v2 = vmax.f32 %v185_v0, 0.0  ;;  %v286_v3 = vmax.f32 %v209_v1, 0.0 }
  0xa6   :  { %365 = vst.msk [vmem:[%s805_s3 + $0xc0] sm:$0xff] %vm63_vm1, %v333_v63  ;;  %v232_v4 = vpop.f32.mrf.mxu2  ;;  %v256_v5 = vpop.f32.mrf.mxu3 }
  0xa7   :  { %v310_v6 = vmin.f32 %v278_v2, 1.0  ;;  %v318_v7 = vmin.f32 %v286_v3, 1.0  ;;  %v233_v8 = vadd.f32 %v640_v45, %v232_v4  ;;  %v257_v9 = vadd.f32 %v640_v45, %v256_v5 }
  0xa9   :  { %342 = vst.msk [vmem:[%s805_s3 + $0x8] sm:$0xff] %vm63_vm1, %v310_v6  ;;  %v294_v10 = vmax.f32 %v233_v8, 0.0  ;;  %v302_v11 = vmax.f32 %v257_v9, 0.0 }
  0xaa   :  { %350 = vst.msk [vmem:[%s805_s3 + $0x48] sm:$0xff] %vm63_vm1, %v318_v7  ;;  %v187_v12 = vpop.f32.mrf.mxu0  ;;  %v211_v13 = vpop.f32.mrf.mxu1 }
  0xab   :  { %v326_v14 = vmin.f32 %v294_v10, 1.0  ;;  %v334_v15 = vmin.f32 %v302_v11, 1.0  ;;  %v188_v16 = vadd.f32 %v640_v45, %v187_v12  ;;  %v212_v17 = vadd.f32 %v640_v45, %v211_v13 }
  0xad   :  { %358 = vst.msk [vmem:[%s805_s3 + $0x88] sm:$0xff] %vm63_vm1, %v326_v14  ;;  %v279_v18 = vmax.f32 %v188_v16, 0.0  ;;  %v287_v19 = vmax.f32 %v212_v17, 0.0 }
  0xae   :  { %366 = vst.msk [vmem:[%s805_s3 + $0xc8] sm:$0xff] %vm63_vm1, %v334_v15  ;;  %v235_v20 = vpop.f32.mrf.mxu2  ;;  %v259_v21 = vpop.f32.mrf.mxu3 }
  0xaf   :  { %v311_v22 = vmin.f32 %v279_v18, 1.0  ;;  %v319_v23 = vmin.f32 %v287_v19, 1.0  ;;  %v236_v24 = vadd.f32 %v640_v45, %v235_v20  ;;  %v260_v25 = vadd.f32 %v640_v45, %v259_v21 }
  0xb1   :  { %343 = vst.msk [vmem:[%s805_s3 + $0x10] sm:$0xff] %vm63_vm1, %v311_v22  ;;  %v295_v26 = vmax.f32 %v236_v24, 0.0  ;;  %v303_v27 = vmax.f32 %v260_v25, 0.0 }
  0xb2   :  { %351 = vst.msk [vmem:[%s805_s3 + $0x50] sm:$0xff] %vm63_vm1, %v319_v23  ;;  %v190_v28 = vpop.f32.mrf.mxu0  ;;  %v214_v29 = vpop.f32.mrf.mxu1 }
  0xb3   :  { %v327_v30 = vmin.f32 %v295_v26, 1.0  ;;  %v335_v31 = vmin.f32 %v303_v27, 1.0  ;;  %v191_v32 = vadd.f32 %v640_v45, %v190_v28  ;;  %v215_v33 = vadd.f32 %v640_v45, %v214_v29 }
  0xb5   :  { %359 = vst.msk [vmem:[%s805_s3 + $0x90] sm:$0xff] %vm63_vm1, %v327_v30  ;;  %v280_v34 = vmax.f32 %v191_v32, 0.0  ;;  %v288_v35 = vmax.f32 %v215_v33, 0.0 }
  0xb6   :  { %367 = vst.msk [vmem:[%s805_s3 + $0xd0] sm:$0xff] %vm63_vm1, %v335_v31  ;;  %v238_v36 = vpop.f32.mrf.mxu2  ;;  %v262_v37 = vpop.f32.mrf.mxu3 }
  0xb7   :  { %v312_v38 = vmin.f32 %v280_v34, 1.0  ;;  %v320_v39 = vmin.f32 %v288_v35, 1.0  ;;  %v239_v40 = vadd.f32 %v640_v45, %v238_v36  ;;  %v263_v41 = vadd.f32 %v640_v45, %v262_v37 }
  0xb9   :  { %344 = vst.msk [vmem:[%s805_s3 + $0x18] sm:$0xff] %vm63_vm1, %v312_v38  ;;  %v296_v42 = vmax.f32 %v239_v40, 0.0  ;;  %v304_v43 = vmax.f32 %v263_v41, 0.0 }
  0xba   :  { %352 = vst.msk [vmem:[%s805_s3 + $0x58] sm:$0xff] %vm63_vm1, %v320_v39  ;;  %v193_v44 = vpop.f32.mrf.mxu0  ;;  %v217_v46 = vpop.f32.mrf.mxu1 }
  0xbb   :  { %v328_v47 = vmin.f32 %v296_v42, 1.0  ;;  %v336_v48 = vmin.f32 %v304_v43, 1.0  ;;  %v194_v49 = vadd.f32 %v640_v45, %v193_v44  ;;  %v218_v50 = vadd.f32 %v640_v45, %v217_v46 }
  0xbd   :  { %360 = vst.msk [vmem:[%s805_s3 + $0x98] sm:$0xff] %vm63_vm1, %v328_v47  ;;  %v281_v51 = vmax.f32 %v194_v49, 0.0  ;;  %v289_v52 = vmax.f32 %v218_v50, 0.0 }
  0xbe   :  { %368 = vst.msk [vmem:[%s805_s3 + $0xd8] sm:$0xff] %vm63_vm1, %v336_v48  ;;  %v241_v53 = vpop.f32.mrf.mxu2  ;;  %v265_v54 = vpop.f32.mrf.mxu3 }
  0xbf   :  { %v313_v55 = vmin.f32 %v281_v51, 1.0  ;;  %v321_v56 = vmin.f32 %v289_v52, 1.0  ;;  %v242_v57 = vadd.f32 %v640_v45, %v241_v53  ;;  %v266_v58 = vadd.f32 %v640_v45, %v265_v54 }
  0xc1   :  { %345 = vst.msk [vmem:[%s805_s3 + $0x20] sm:$0xff] %vm63_vm1, %v313_v55  ;;  %v297_v59 = vmax.f32 %v242_v57, 0.0  ;;  %v305_v60 = vmax.f32 %v266_v58, 0.0 }
  0xc2   :  { %353 = vst.msk [vmem:[%s805_s3 + $0x60] sm:$0xff] %vm63_vm1, %v321_v56  ;;  %v196_v61 = vpop.f32.mrf.mxu0  ;;  %v220_v62 = vpop.f32.mrf.mxu1 }
  0xc3   :  { %v329_v63 = vmin.f32 %v297_v59, 1.0  ;;  %v337_v0 = vmin.f32 %v305_v60, 1.0  ;;  %v197_v1 = vadd.f32 %v640_v45, %v196_v61  ;;  %v221_v2 = vadd.f32 %v640_v45, %v220_v62 }
  0xc5   :  { %361 = vst.msk [vmem:[%s805_s3 + $0xa0] sm:$0xff] %vm63_vm1, %v329_v63  ;;  %v282_v3 = vmax.f32 %v197_v1, 0.0  ;;  %v290_v4 = vmax.f32 %v221_v2, 0.0 }
  0xc6   :  { %369 = vst.msk [vmem:[%s805_s3 + $0xe0] sm:$0xff] %vm63_vm1, %v337_v0  ;;  %v244_v5 = vpop.f32.mrf.mxu2  ;;  %v268_v6 = vpop.f32.mrf.mxu3 }
  0xc7   :  { %v314_v7 = vmin.f32 %v282_v3, 1.0  ;;  %v322_v8 = vmin.f32 %v290_v4, 1.0  ;;  %v245_v9 = vadd.f32 %v640_v45, %v244_v5  ;;  %v269_v10 = vadd.f32 %v640_v45, %v268_v6 }
  0xc9   :  { %346 = vst.msk [vmem:[%s805_s3 + $0x28] sm:$0xff] %vm63_vm1, %v314_v7  ;;  %v298_v11 = vmax.f32 %v245_v9, 0.0  ;;  %v306_v12 = vmax.f32 %v269_v10, 0.0 }
  0xca   :  { %354 = vst.msk [vmem:[%s805_s3 + $0x68] sm:$0xff] %vm63_vm1, %v322_v8  ;;  %v199_v13 = vpop.f32.mrf.mxu0  ;;  %v223_v14 = vpop.f32.mrf.mxu1 }
  0xcb   :  { %v330_v15 = vmin.f32 %v298_v11, 1.0  ;;  %v338_v16 = vmin.f32 %v306_v12, 1.0  ;;  %v200_v17 = vadd.f32 %v640_v45, %v199_v13  ;;  %v224_v18 = vadd.f32 %v640_v45, %v223_v14 }
  0xcd   :  { %362 = vst.msk [vmem:[%s805_s3 + $0xa8] sm:$0xff] %vm63_vm1, %v330_v15  ;;  %v283_v19 = vmax.f32 %v200_v17, 0.0  ;;  %v291_v20 = vmax.f32 %v224_v18, 0.0 }
  0xce   :  { %370 = vst.msk [vmem:[%s805_s3 + $0xe8] sm:$0xff] %vm63_vm1, %v338_v16  ;;  %v247_v21 = vpop.f32.mrf.mxu2  ;;  %v271_v22 = vpop.f32.mrf.mxu3 }
  0xcf   :  { %v315_v23 = vmin.f32 %v283_v19, 1.0  ;;  %v323_v24 = vmin.f32 %v291_v20, 1.0  ;;  %v248_v25 = vadd.f32 %v640_v45, %v247_v21  ;;  %v272_v26 = vadd.f32 %v640_v45, %v271_v22 }
  0xd1   :  { %347 = vst.msk [vmem:[%s805_s3 + $0x30] sm:$0xff] %vm63_vm1, %v315_v23  ;;  %v299_v27 = vmax.f32 %v248_v25, 0.0  ;;  %v307_v28 = vmax.f32 %v272_v26, 0.0 }
  0xd2   :  { %355 = vst.msk [vmem:[%s805_s3 + $0x70] sm:$0xff] %vm63_vm1, %v323_v24  ;;  %v202_v29 = vpop.f32.mrf.mxu0  ;;  %v226_v30 = vpop.f32.mrf.mxu1 }
  0xd3   :  { %v331_v31 = vmin.f32 %v299_v27, 1.0  ;;  %v339_v32 = vmin.f32 %v307_v28, 1.0  ;;  %v203_v33 = vadd.f32 %v640_v45, %v202_v29  ;;  %v227_v34 = vadd.f32 %v640_v45, %v226_v30 }
  0xd5   :  { %363 = vst.msk [vmem:[%s805_s3 + $0xb0] sm:$0xff] %vm63_vm1, %v331_v31  ;;  %v284_v35 = vmax.f32 %v203_v33, 0.0  ;;  %v292_v36 = vmax.f32 %v227_v34, 0.0 }
  0xd6   :  { %371 = vst.msk [vmem:[%s805_s3 + $0xf0] sm:$0xff] %vm63_vm1, %v339_v32  ;;  %v250_v37 = vpop.f32.mrf.mxu2  ;;  %v274_v38 = vpop.f32.mrf.mxu3 }
  0xd7   :  { %v316_v39 = vmin.f32 %v284_v35, 1.0  ;;  %v324_v40 = vmin.f32 %v292_v36, 1.0  ;;  %v251_v41 = vadd.f32 %v640_v45, %v250_v37  ;;  %v275_v42 = vadd.f32 %v640_v45, %v274_v38 }
  0xd9   :  { %348 = vst.msk [vmem:[%s805_s3 + $0x38] sm:$0xff] %vm63_vm1, %v316_v39  ;;  %v300_v43 = vmax.f32 %v251_v41, 0.0  ;;  %v308_v44 = vmax.f32 %v275_v42, 0.0 }
  0xda   :  { %356 = vst.msk [vmem:[%s805_s3 + $0x78] sm:$0xff] %vm63_vm1, %v324_v40 }
  0xdb   :  { %v332_v46 = vmin.f32 %v300_v43, 1.0  ;;  %v340_v47 = vmin.f32 %v308_v44, 1.0 }
  0xdd   :  { %364 = vst.msk [vmem:[%s805_s3 + $0xb8] sm:$0xff] %vm63_vm1, %v332_v46 }
  0xde   :  { %372 = vst.msk [vmem:[%s805_s3 + $0xf8] sm:$0xff] %vm63_vm1, %v340_v47 }

</bundles_post_ra>
